<compile_context>
chip_gen: v7x
topology: tpu7x:2x2x1
jax: 0.10.0
libtpu: 0.0.40
codegen_flags: <defaults>
</compile_context>

<pallas_src>
import functools

import jax
import jax.numpy as jnp
from jax.experimental import pallas as pl
from jax.experimental.pallas import tpu as pltpu


# ------------------------------ Pallas kernel -------------------------------


def _fused_attention_kernel(x_ref, vec_ref, qkv_w_ref, out_w_ref, o_ref, *,
                            heads, dim_head, eps):
    """One batch element per grid step; everything stays in VMEM/vregs."""
    x = x_ref[0].astype(jnp.float32)                         # (N, D)

    # ---- LayerNorm (f32, VPU) ----
    g = vec_ref[0:1, :]                                      # (1, D)
    b = vec_ref[1:2, :]                                      # (1, D)
    out_b = vec_ref[2:3, :]                                   # (1, D)
    mean = jnp.mean(x, axis=-1, keepdims=True)
    var = jnp.mean((x - mean) * (x - mean), axis=-1, keepdims=True)
    xn = (x - mean) * jax.lax.rsqrt(var + eps) * g + b        # (N, D) f32

    # ---- QKV projection, no bias (bf16 MXU operands, f32 accumulate) ----
    qkv = jnp.dot(xn.astype(jnp.bfloat16), qkv_w_ref[...],
                  preferred_element_type=jnp.float32)         # (N, 3*inner) f32

    inner = heads * dim_head
    scale = dim_head ** -0.5

    # ---- per-head attention (unrolled static loop; tiny, stays in vregs) ----
    head_outs = []
    for h in range(heads):
        lo = h * dim_head
        q = qkv[:, lo:lo + dim_head]                          # (N, Dh)
        k = qkv[:, inner + lo:inner + lo + dim_head]          # (N, Dh)
        v = qkv[:, 2 * inner + lo:2 * inner + lo + dim_head]  # (N, Dh)

        # scores: contract last axes directly (no explicit transpose of k)
        s = jax.lax.dot_general(
            q.astype(jnp.bfloat16), k.astype(jnp.bfloat16),
            dimension_numbers=(((1,), (1,)), ((), ())),
            preferred_element_type=jnp.float32) * scale       # (N, N) f32

        # softmax over keys (f32); divide replaced by approx reciprocal (EUP)
        m = jnp.max(s, axis=-1, keepdims=True)
        e = jnp.exp(s - m)
        p = e * pl.reciprocal(jnp.sum(e, axis=-1, keepdims=True), approx=True)
        # dropout p=0.0 -> identity

        head_outs.append(
            jnp.dot(p.astype(jnp.bfloat16), v.astype(jnp.bfloat16),
                    preferred_element_type=jnp.float32))      # (N, Dh) f32

    # head-major re-merge == torch's transpose(1,2).view(B, N, inner)
    o = jnp.concatenate(head_outs, axis=-1)                   # (N, inner) f32

    # ---- output projection (+ bias) ----
    y = jnp.dot(o.astype(jnp.bfloat16), out_w_ref[...],
                preferred_element_type=jnp.float32) + out_b   # (N, D) f32
    o_ref[0] = y.astype(o_ref.dtype)


# ------------------------------ wrapper --------------------------------------


def attention_forward(x, params, *, heads, dim_head, eps=1e-5):
    """x: (B, N, D) f32.  Returns (B, N, D) f32."""
    B, N, D = x.shape
    inner = heads * dim_head

    # pack the three D-length vectors into one VMEM block (fewer DMAs)
    vecs = jnp.stack([params["ln_g"], params["ln_b"], params["out_b"]]
                     ).astype(jnp.float32)                    # (3, D)
    qkv_w = params["qkv_w"].astype(jnp.bfloat16)              # (D, 3*inner)
    out_w = params["out_w"].astype(jnp.bfloat16)              # (inner, D)

    return pl.pallas_call(
        functools.partial(_fused_attention_kernel,
                          heads=heads, dim_head=dim_head, eps=eps),
        out_shape=jax.ShapeDtypeStruct((B, N, D), jnp.float32),
        grid=(B,),
        in_specs=[
            pl.BlockSpec((1, N, D), lambda b: (b, 0, 0)),      # x: one batch row
            pl.BlockSpec((3, D), lambda b: (0, 0)),            # packed vectors
            pl.BlockSpec((D, 3 * inner), lambda b: (0, 0)),    # qkv weight
            pl.BlockSpec((inner, D), lambda b: (0, 0)),        # out-proj weight
        ],
        out_specs=pl.BlockSpec((1, N, D), lambda b: (b, 0, 0)),
        compiler_params=pltpu.CompilerParams(
            dimension_semantics=("parallel",)),                # megacore-ready
    )(x.astype(jnp.float32), vecs, qkv_w, out_w)


# --------------------------- pure-JAX reference -------------------------------


def attention_reference(x, params, *, heads, dim_head, eps=1e-5):
    B, N, D = x.shape
    inner = heads * dim_head
    mean = jnp.mean(x, axis=-1, keepdims=True)
    var = jnp.mean((x - mean) ** 2, axis=-1, keepdims=True)
    xn = (x - mean) / jnp.sqrt(var + eps) * params["ln_g"] + params["ln_b"]
    qkv = xn @ params["qkv_w"]
    q, k, v = jnp.split(qkv, 3, axis=-1)

    def to_heads(t):
        return t.reshape(B, N, heads, dim_head).transpose(0, 2, 1, 3)

    q, k, v = map(to_heads, (q, k, v))
    s = jnp.einsum("bhqd,bhkd->bhqk", q, k) * dim_head ** -0.5
    p = jax.nn.softmax(s, axis=-1)
    o = jnp.einsum("bhqk,bhkd->bhqd", p, v)
    o = o.transpose(0, 2, 1, 3).reshape(B, N, inner)
    return o @ params["out_w"] + params["out_b"]


# ------------------------------- main -----------------------------------------


if __name__ == "__main__":
    B, N, DIM, HEADS, DIM_HEAD = 2, 16, 32, 4, 8
    INNER = HEADS * DIM_HEAD

    key = jax.random.PRNGKey(0)
    kx, k1, k2, k3 = jax.random.split(key, 4)
    x = jax.random.normal(kx, (B, N, DIM), jnp.float32)
    params = {
        "ln_g": jnp.ones((DIM,), jnp.float32),
        "ln_b": jnp.zeros((DIM,), jnp.float32),
        "qkv_w": 0.1 * jax.random.normal(k1, (DIM, 3 * INNER), jnp.float32),
        "out_w": 0.1 * jax.random.normal(k2, (INNER, DIM), jnp.float32),
        "out_b": 0.1 * jax.random.normal(k3, (DIM,), jnp.float32),
    }

    fwd = jax.jit(functools.partial(attention_forward,
                                    heads=HEADS, dim_head=DIM_HEAD))
    out = fwd(x, params)
    jax.block_until_ready(out)

    ref = attention_reference(x, params, heads=HEADS, dim_head=DIM_HEAD)
    assert out.shape == (B, N, DIM)
    assert bool(jnp.all(jnp.isfinite(out)))
    # loose tolerance: kernel uses bf16 MXU operands + approx reciprocal,
    # reference is pure f32
    err = float(jnp.max(jnp.abs(out - ref)))
    assert err < 5e-2, f"max abs error {err}"
    print("KERNEL_OK")
</pallas_src>

<mosaic_0001>
module attributes {stable_mosaic.version = 11 : i64} {
  func.func @_fused_attention_kernel(%arg0: i32, %arg1: memref<1x16x32xf32, #tpu.memory_space<vmem>>, %arg2: memref<3x32xf32, #tpu.memory_space<vmem>>, %arg3: memref<32x96xbf16, #tpu.memory_space<vmem>>, %arg4: memref<32x32xbf16, #tpu.memory_space<vmem>>, %arg5: memref<1x16x32xf32, #tpu.memory_space<vmem>>) attributes {dimension_semantics = [#tpu.dimension_semantics<parallel>], iteration_bounds = array<i64: 2>, scalar_prefetch = 0 : i64, scratch_operands = 0 : i64, tpu.core_type = #tpu.core_type<tc>, window_params = [{transform_indices = @transform_0, window_bounds = array<i64: 1, 16, 32>}, {pipeline_mode = #tpu.pipeline_mode<synchronous>, transform_indices = @transform_1, window_bounds = array<i64: 3, 32>}, {pipeline_mode = #tpu.pipeline_mode<synchronous>, transform_indices = @transform_2, window_bounds = array<i64: 32, 96>}, {pipeline_mode = #tpu.pipeline_mode<synchronous>, transform_indices = @transform_3, window_bounds = array<i64: 32, 32>}, {transform_indices = @transform_4, window_bounds = array<i64: 1, 16, 32>}]} {
    %c0 = arith.constant 0 : index
    %c0_0 = arith.constant 0 : index
    %c0_1 = arith.constant 0 : index
    %0 = vector.load %arg1[%c0, %c0_0, %c0_1] : memref<1x16x32xf32, #tpu.memory_space<vmem>>, vector<1x16x32xf32>
    %1 = vector.shape_cast %0 : vector<1x16x32xf32> to vector<16x32xf32>
    %c0_2 = arith.constant 0 : index
    %c0_3 = arith.constant 0 : index
    %2 = vector.load %arg2[%c0_2, %c0_3] : memref<3x32xf32, #tpu.memory_space<vmem>>, vector<1x32xf32>
    %c1 = arith.constant 1 : index
    %c0_4 = arith.constant 0 : index
    %3 = vector.load %arg2[%c1, %c0_4] : memref<3x32xf32, #tpu.memory_space<vmem>>, vector<1x32xf32>
    %c2 = arith.constant 2 : index
    %c0_5 = arith.constant 0 : index
    %4 = vector.load %arg2[%c2, %c0_5] : memref<3x32xf32, #tpu.memory_space<vmem>>, vector<1x32xf32>
    %cst = arith.constant dense<0.000000e+00> : vector<16xf32>
    %5 = vector.multi_reduction <add>, %1, %cst [1] : vector<16x32xf32> to vector<16xf32>
    %6 = vector.shape_cast %5 : vector<16xf32> to vector<16x1xf32>
    %cst_6 = arith.constant 3.200000e+01 : f32
    %7 = vector.broadcast %cst_6 : f32 to vector<16x1xf32>
    %8 = arith.divf %6, %7 : vector<16x1xf32>
    %9 = vector.broadcast %8 : vector<16x1xf32> to vector<16x32xf32>
    %10 = arith.subf %1, %9 : vector<16x32xf32>
    %11 = vector.broadcast %8 : vector<16x1xf32> to vector<16x32xf32>
    %12 = arith.subf %1, %11 : vector<16x32xf32>
    %13 = arith.mulf %10, %12 : vector<16x32xf32>
    %cst_7 = arith.constant dense<0.000000e+00> : vector<16xf32>
    %14 = vector.multi_reduction <add>, %13, %cst_7 [1] : vector<16x32xf32> to vector<16xf32>
    %15 = vector.shape_cast %14 : vector<16xf32> to vector<16x1xf32>
    %cst_8 = arith.constant 3.200000e+01 : f32
    %16 = vector.broadcast %cst_8 : f32 to vector<16x1xf32>
    %17 = arith.divf %15, %16 : vector<16x1xf32>
    %18 = vector.broadcast %8 : vector<16x1xf32> to vector<16x32xf32>
    %19 = arith.subf %1, %18 : vector<16x32xf32>
    %cst_9 = arith.constant 9.99999974E-6 : f32
    %20 = vector.broadcast %cst_9 : f32 to vector<16x1xf32>
    %21 = arith.addf %17, %20 : vector<16x1xf32>
    %22 = math.rsqrt %21 : vector<16x1xf32>
    %23 = vector.broadcast %22 : vector<16x1xf32> to vector<16x32xf32>
    %24 = arith.mulf %19, %23 : vector<16x32xf32>
    %25 = vector.broadcast %2 : vector<1x32xf32> to vector<16x32xf32>
    %26 = arith.mulf %24, %25 : vector<16x32xf32>
    %27 = vector.broadcast %3 : vector<1x32xf32> to vector<16x32xf32>
    %28 = arith.addf %26, %27 : vector<16x32xf32>
    %29 = arith.truncf %28 : vector<16x32xf32> to vector<16x32xbf16>
    %c0_10 = arith.constant 0 : index
    %c0_11 = arith.constant 0 : index
    %30 = vector.load %arg3[%c0_10, %c0_11] : memref<32x96xbf16, #tpu.memory_space<vmem>>, vector<32x96xbf16>
    %cst_12 = arith.constant dense<0.000000e+00> : vector<16x96xf32>
    %31 = tpu.matmul %29, %30, %cst_12 {dimension_numbers = #tpu.dot_dimension_numbers<[1], [0], [0], [1], [0, 0, 1, 1], [], []>} : vector<16x32xbf16>, vector<32x96xbf16>, vector<16x96xf32> -> vector<16x96xf32>
    %32 = vector.extract_strided_slice %31 {offsets = [0, 0], sizes = [16, 8], strides = [1, 1]} : vector<16x96xf32> to vector<16x8xf32>
    %33 = vector.extract_strided_slice %31 {offsets = [0, 32], sizes = [16, 8], strides = [1, 1]} : vector<16x96xf32> to vector<16x8xf32>
    %34 = vector.extract_strided_slice %31 {offsets = [0, 64], sizes = [16, 8], strides = [1, 1]} : vector<16x96xf32> to vector<16x8xf32>
    %35 = arith.truncf %32 : vector<16x8xf32> to vector<16x8xbf16>
    %36 = arith.truncf %33 : vector<16x8xf32> to vector<16x8xbf16>
    %cst_13 = arith.constant dense<0.000000e+00> : vector<16x16xf32>
    %37 = tpu.matmul %35, %36, %cst_13 {dimension_numbers = #tpu.dot_dimension_numbers<[1], [1], [0], [0], [0, 0, 1, 0], [], []>} : vector<16x8xbf16>, vector<16x8xbf16>, vector<16x16xf32> -> vector<16x16xf32>
    %cst_14 = arith.constant 0.353553385 : f32
    %38 = vector.broadcast %cst_14 : f32 to vector<16x16xf32>
    %39 = arith.mulf %37, %38 : vector<16x16xf32>
    %cst_15 = arith.constant dense<0xFF800000> : vector<16xf32>
    %40 = vector.multi_reduction <maximumf>, %39, %cst_15 [1] : vector<16x16xf32> to vector<16xf32>
    %41 = vector.shape_cast %40 : vector<16xf32> to vector<16x1xf32>
    %42 = vector.broadcast %41 : vector<16x1xf32> to vector<16x16xf32>
    %43 = arith.subf %39, %42 : vector<16x16xf32>
    %44 = math.exp %43 : vector<16x16xf32>
    %cst_16 = arith.constant dense<0.000000e+00> : vector<16xf32>
    %45 = vector.multi_reduction <add>, %44, %cst_16 [1] : vector<16x16xf32> to vector<16xf32>
    %46 = vector.shape_cast %45 : vector<16xf32> to vector<16x1xf32>
    %47 = tpu.reciprocal %46 {approx = true} : vector<16x1xf32> -> vector<16x1xf32>
    %48 = vector.broadcast %47 : vector<16x1xf32> to vector<16x16xf32>
    %49 = arith.mulf %44, %48 : vector<16x16xf32>
    %50 = arith.truncf %49 : vector<16x16xf32> to vector<16x16xbf16>
    %51 = arith.truncf %34 : vector<16x8xf32> to vector<16x8xbf16>
    %cst_17 = arith.constant dense<0.000000e+00> : vector<16x8xf32>
    %52 = tpu.matmul %50, %51, %cst_17 {dimension_numbers = #tpu.dot_dimension_numbers<[1], [0], [0], [1], [0, 0, 1, 1], [], []>} : vector<16x16xbf16>, vector<16x8xbf16>, vector<16x8xf32> -> vector<16x8xf32>
    %53 = vector.extract_strided_slice %31 {offsets = [0, 8], sizes = [16, 8], strides = [1, 1]} : vector<16x96xf32> to vector<16x8xf32>
    %54 = vector.extract_strided_slice %31 {offsets = [0, 40], sizes = [16, 8], strides = [1, 1]} : vector<16x96xf32> to vector<16x8xf32>
    %55 = vector.extract_strided_slice %31 {offsets = [0, 72], sizes = [16, 8], strides = [1, 1]} : vector<16x96xf32> to vector<16x8xf32>
    %56 = arith.truncf %53 : vector<16x8xf32> to vector<16x8xbf16>
    %57 = arith.truncf %54 : vector<16x8xf32> to vector<16x8xbf16>
    %cst_18 = arith.constant dense<0.000000e+00> : vector<16x16xf32>
    %58 = tpu.matmul %56, %57, %cst_18 {dimension_numbers = #tpu.dot_dimension_numbers<[1], [1], [0], [0], [0, 0, 1, 0], [], []>} : vector<16x8xbf16>, vector<16x8xbf16>, vector<16x16xf32> -> vector<16x16xf32>
    %cst_19 = arith.constant 0.353553385 : f32
    %59 = vector.broadcast %cst_19 : f32 to vector<16x16xf32>
    %60 = arith.mulf %58, %59 : vector<16x16xf32>
    %cst_20 = arith.constant dense<0xFF800000> : vector<16xf32>
    %61 = vector.multi_reduction <maximumf>, %60, %cst_20 [1] : vector<16x16xf32> to vector<16xf32>
    %62 = vector.shape_cast %61 : vector<16xf32> to vector<16x1xf32>
    %63 = vector.broadcast %62 : vector<16x1xf32> to vector<16x16xf32>
    %64 = arith.subf %60, %63 : vector<16x16xf32>
    %65 = math.exp %64 : vector<16x16xf32>
    %cst_21 = arith.constant dense<0.000000e+00> : vector<16xf32>
    %66 = vector.multi_reduction <add>, %65, %cst_21 [1] : vector<16x16xf32> to vector<16xf32>
    %67 = vector.shape_cast %66 : vector<16xf32> to vector<16x1xf32>
    %68 = tpu.reciprocal %67 {approx = true} : vector<16x1xf32> -> vector<16x1xf32>
    %69 = vector.broadcast %68 : vector<16x1xf32> to vector<16x16xf32>
    %70 = arith.mulf %65, %69 : vector<16x16xf32>
    %71 = arith.truncf %70 : vector<16x16xf32> to vector<16x16xbf16>
    %72 = arith.truncf %55 : vector<16x8xf32> to vector<16x8xbf16>
    %cst_22 = arith.constant dense<0.000000e+00> : vector<16x8xf32>
    %73 = tpu.matmul %71, %72, %cst_22 {dimension_numbers = #tpu.dot_dimension_numbers<[1], [0], [0], [1], [0, 0, 1, 1], [], []>} : vector<16x16xbf16>, vector<16x8xbf16>, vector<16x8xf32> -> vector<16x8xf32>
    %74 = vector.extract_strided_slice %31 {offsets = [0, 16], sizes = [16, 8], strides = [1, 1]} : vector<16x96xf32> to vector<16x8xf32>
    %75 = vector.extract_strided_slice %31 {offsets = [0, 48], sizes = [16, 8], strides = [1, 1]} : vector<16x96xf32> to vector<16x8xf32>
    %76 = vector.extract_strided_slice %31 {offsets = [0, 80], sizes = [16, 8], strides = [1, 1]} : vector<16x96xf32> to vector<16x8xf32>
    %77 = arith.truncf %74 : vector<16x8xf32> to vector<16x8xbf16>
    %78 = arith.truncf %75 : vector<16x8xf32> to vector<16x8xbf16>
    %cst_23 = arith.constant dense<0.000000e+00> : vector<16x16xf32>
    %79 = tpu.matmul %77, %78, %cst_23 {dimension_numbers = #tpu.dot_dimension_numbers<[1], [1], [0], [0], [0, 0, 1, 0], [], []>} : vector<16x8xbf16>, vector<16x8xbf16>, vector<16x16xf32> -> vector<16x16xf32>
    %cst_24 = arith.constant 0.353553385 : f32
    %80 = vector.broadcast %cst_24 : f32 to vector<16x16xf32>
    %81 = arith.mulf %79, %80 : vector<16x16xf32>
    %cst_25 = arith.constant dense<0xFF800000> : vector<16xf32>
    %82 = vector.multi_reduction <maximumf>, %81, %cst_25 [1] : vector<16x16xf32> to vector<16xf32>
    %83 = vector.shape_cast %82 : vector<16xf32> to vector<16x1xf32>
    %84 = vector.broadcast %83 : vector<16x1xf32> to vector<16x16xf32>
    %85 = arith.subf %81, %84 : vector<16x16xf32>
    %86 = math.exp %85 : vector<16x16xf32>
    %cst_26 = arith.constant dense<0.000000e+00> : vector<16xf32>
    %87 = vector.multi_reduction <add>, %86, %cst_26 [1] : vector<16x16xf32> to vector<16xf32>
    %88 = vector.shape_cast %87 : vector<16xf32> to vector<16x1xf32>
    %89 = tpu.reciprocal %88 {approx = true} : vector<16x1xf32> -> vector<16x1xf32>
    %90 = vector.broadcast %89 : vector<16x1xf32> to vector<16x16xf32>
    %91 = arith.mulf %86, %90 : vector<16x16xf32>
    %92 = arith.truncf %91 : vector<16x16xf32> to vector<16x16xbf16>
    %93 = arith.truncf %76 : vector<16x8xf32> to vector<16x8xbf16>
    %cst_27 = arith.constant dense<0.000000e+00> : vector<16x8xf32>
    %94 = tpu.matmul %92, %93, %cst_27 {dimension_numbers = #tpu.dot_dimension_numbers<[1], [0], [0], [1], [0, 0, 1, 1], [], []>} : vector<16x16xbf16>, vector<16x8xbf16>, vector<16x8xf32> -> vector<16x8xf32>
    %95 = vector.extract_strided_slice %31 {offsets = [0, 24], sizes = [16, 8], strides = [1, 1]} : vector<16x96xf32> to vector<16x8xf32>
    %96 = vector.extract_strided_slice %31 {offsets = [0, 56], sizes = [16, 8], strides = [1, 1]} : vector<16x96xf32> to vector<16x8xf32>
    %97 = vector.extract_strided_slice %31 {offsets = [0, 88], sizes = [16, 8], strides = [1, 1]} : vector<16x96xf32> to vector<16x8xf32>
    %98 = arith.truncf %95 : vector<16x8xf32> to vector<16x8xbf16>
    %99 = arith.truncf %96 : vector<16x8xf32> to vector<16x8xbf16>
    %cst_28 = arith.constant dense<0.000000e+00> : vector<16x16xf32>
    %100 = tpu.matmul %98, %99, %cst_28 {dimension_numbers = #tpu.dot_dimension_numbers<[1], [1], [0], [0], [0, 0, 1, 0], [], []>} : vector<16x8xbf16>, vector<16x8xbf16>, vector<16x16xf32> -> vector<16x16xf32>
    %cst_29 = arith.constant 0.353553385 : f32
    %101 = vector.broadcast %cst_29 : f32 to vector<16x16xf32>
    %102 = arith.mulf %100, %101 : vector<16x16xf32>
    %cst_30 = arith.constant dense<0xFF800000> : vector<16xf32>
    %103 = vector.multi_reduction <maximumf>, %102, %cst_30 [1] : vector<16x16xf32> to vector<16xf32>
    %104 = vector.shape_cast %103 : vector<16xf32> to vector<16x1xf32>
    %105 = vector.broadcast %104 : vector<16x1xf32> to vector<16x16xf32>
    %106 = arith.subf %102, %105 : vector<16x16xf32>
    %107 = math.exp %106 : vector<16x16xf32>
    %cst_31 = arith.constant dense<0.000000e+00> : vector<16xf32>
    %108 = vector.multi_reduction <add>, %107, %cst_31 [1] : vector<16x16xf32> to vector<16xf32>
    %109 = vector.shape_cast %108 : vector<16xf32> to vector<16x1xf32>
    %110 = tpu.reciprocal %109 {approx = true} : vector<16x1xf32> -> vector<16x1xf32>
    %111 = vector.broadcast %110 : vector<16x1xf32> to vector<16x16xf32>
    %112 = arith.mulf %107, %111 : vector<16x16xf32>
    %113 = arith.truncf %112 : vector<16x16xf32> to vector<16x16xbf16>
    %114 = arith.truncf %97 : vector<16x8xf32> to vector<16x8xbf16>
    %cst_32 = arith.constant dense<0.000000e+00> : vector<16x8xf32>
    %115 = tpu.matmul %113, %114, %cst_32 {dimension_numbers = #tpu.dot_dimension_numbers<[1], [0], [0], [1], [0, 0, 1, 1], [], []>} : vector<16x16xbf16>, vector<16x8xbf16>, vector<16x8xf32> -> vector<16x8xf32>
    %116 = tpu.concatenate %52, %73, %94, %115 in 1 : vector<16x8xf32>, vector<16x8xf32>, vector<16x8xf32>, vector<16x8xf32> -> vector<16x32xf32>
    %117 = arith.truncf %116 : vector<16x32xf32> to vector<16x32xbf16>
    %c0_33 = arith.constant 0 : index
    %c0_34 = arith.constant 0 : index
    %118 = vector.load %arg4[%c0_33, %c0_34] : memref<32x32xbf16, #tpu.memory_space<vmem>>, vector<32x32xbf16>
    %cst_35 = arith.constant dense<0.000000e+00> : vector<16x32xf32>
    %119 = tpu.matmul %117, %118, %cst_35 {dimension_numbers = #tpu.dot_dimension_numbers<[1], [0], [0], [1], [0, 0, 1, 1], [], []>} : vector<16x32xbf16>, vector<32x32xbf16>, vector<16x32xf32> -> vector<16x32xf32>
    %120 = vector.broadcast %4 : vector<1x32xf32> to vector<16x32xf32>
    %121 = arith.addf %119, %120 : vector<16x32xf32>
    %c0_36 = arith.constant 0 : index
    %c0_37 = arith.constant 0 : index
    %c0_38 = arith.constant 0 : index
    %122 = vector.load %arg5[%c0_36, %c0_37, %c0_38] : memref<1x16x32xf32, #tpu.memory_space<vmem>>, vector<1x16x32xf32>
    %123 = vector.shape_cast %122 : vector<1x16x32xf32> to vector<16x32xf32>
    %124 = vector.shape_cast %121 : vector<16x32xf32> to vector<1x16x32xf32>
    tpu.vector_store %arg5[%c0_36, %c0_37, %c0_38], %124 {strides = array<i32>} : memref<1x16x32xf32, #tpu.memory_space<vmem>>, vector<1x16x32xf32>,
    return
  }
  func.func @transform_0(%arg0: i32) -> (i32, i32, i32) {
    %c0_i32 = arith.constant 0 : i32
    %c0_i32_0 = arith.constant 0 : i32
    %c0_i32_1 = arith.constant 0 : i32
    return %arg0, %c0_i32, %c0_i32_0 : i32, i32, i32
  }
  func.func @transform_1(%arg0: i32) -> (i32, i32) {
    %c0_i32 = arith.constant 0 : i32
    %c0_i32_0 = arith.constant 0 : i32
    %c0_i32_1 = arith.constant 0 : i32
    return %c0_i32, %c0_i32_0 : i32, i32
  }
  func.func @transform_2(%arg0: i32) -> (i32, i32) {
    %c0_i32 = arith.constant 0 : i32
    %c0_i32_0 = arith.constant 0 : i32
    %c0_i32_1 = arith.constant 0 : i32
    return %c0_i32, %c0_i32_0 : i32, i32
  }
  func.func @transform_3(%arg0: i32) -> (i32, i32) {
    %c0_i32 = arith.constant 0 : i32
    %c0_i32_0 = arith.constant 0 : i32
    %c0_i32_1 = arith.constant 0 : i32
    return %c0_i32, %c0_i32_0 : i32, i32
  }
  func.func @transform_4(%arg0: i32) -> (i32, i32, i32) {
    %c0_i32 = arith.constant 0 : i32
    %c0_i32_0 = arith.constant 0 : i32
    %c0_i32_1 = arith.constant 0 : i32
    return %arg0, %c0_i32, %c0_i32_0 : i32, i32, i32
  }
}

</mosaic_0001>

<bundles_post_ra>
// kernel: attention_forward.1
= control target key start
LH: loop header
LB: loop body
LE: loop exit
PB: predicated region body
PF: predicated region fallthrough
CT: control target
= control target key end

     0   :  { %9 = vsyncpa [#allocation3], 0  ;;  %s1518_s0 = inlined_call_operand.vmem [shape: f32[2,16,32], index: 0, kind: input, shape index: {}]   ;;  %s1519_s1 = inlined_call_operand.vmem [shape: f32[3,32], index: 1, kind: input, shape index: {}]   ;;  %s1520_s2 = inlined_call_operand.vmem [shape: bf16[32,96], index: 2, kind: input, shape index: {}]   ;;  %s1521_s3 = inlined_call_operand.vmem [shape: bf16[32,32], index: 3, kind: input, shape index: {}]   ;;  %s1522_s4 = inlined_call_operand.hbm [shape: f32[2,16,32], index: 4, kind: output, shape index: {}]  }
   0x1   :  { %11 = vsyncpa [#allocation3 + $0x1], 0  ;;  %s1306_s15 = smov 0   ;;  %s1308_s16 = smov 0  }
   0x2   :  { %s1310_s17 = smov 0   ;;  %s1312_s18 = smov 0  }
   0x3 LB: > { %s1327_s19 = sadd.s32 4294967295, %s1261_s18   ;;  %s971_s20 = sadd.s32 4294967294, %s1261_s18   ;;  %s1261_s18 = sphi %s1312_s18, %s1528_s18   ;;  %s1257_s17 = sphi %s1310_s17, %s1527_s17   ;;  %s1253_s16 = sphi %s1308_s16, %s1526_s16   ;;  %s1249_s15 = sphi %s1306_s15, %s1525_s15  }
   0x4   : > { %s1331_s21 = sadd.s32 1, %s1261_s18   ;;  %s113_s22 = sadd.s32 1, %s1257_s17 }
   0x5   : > { %s110_s23 = ssub.s32 %s1261_s18, %s1331_s21  ;;  %p123_p0 = scmp.ne.s32.totalorder %s1257_s17, %s1253_s16 }
   0x6   : > { %p111_p1 = scmp.eq.s32.totalorder %s110_s23, 0  ;;  %p124_p2 = scmp.eq.s32.totalorder %s1327_s19, 1 }
   0x7   : > { %p129_p3 = scmp.ne.s32.totalorder %s1253_s16, %s1249_s15  ;;  %p130_p4 = scmp.eq.s32.totalorder %s971_s20, 1 }
   0x8   : > { %s1342_s24 = scalar_select %p111_p1, %s1257_s17, %s113_s22  }
   0x9   : > { %p1344_p5 = por %p124_p2, %p123_p0  ;;  %p1348_p6 = por %p130_p4, %p129_p3 }
   0xa   : > { %p974_p7 = scmp.ge.s32.totalorder %s1261_s18, 1  ;;  %p165_p8 = scmp.lt.s32.totalorder %s1261_s18, 3 }
   0xc   : > { %p166_p9 = pnand %p974_p7, %p165_p8 }
   0xd   : > { %p191_p10 = scmp.lt.s32.totalorder (!%p166_p9), %s1327_s19, 1  ;;  %vm202_vm0 = vcmask (!%p166_p9), 261120   ;;  %v1159_v14 = vld [vmem:[%s1520_s2] sm:$0xff] (!%p166_p9)   ;;  %v1263_v15 = vmov (!%p166_p9), 0.0   ;;  %v1160_v16 = vld [vmem:[%s1520_s2 + $0x8] sm:$0xff] (!%p166_p9)   ;;  %vm1264_vm1 = vmmov (!%p166_p9), 0  }
   0xe   : > { %169 = sbr.rel (%p166_p9) target bundleno = 1815 (0x717), region = 36  ;;  %1024 = vmatprep.subr.bf16.mxu0 (!%p166_p9), %v1263_v15  ;;  %1032 = vmatprep.subr.bf16.mxu1 (!%p166_p9), %v1263_v15  ;;  %v978_v25 = vld [vmem:[%s1519_s1] ss:$0 sm:$0xff] (!%p166_p9)  ;;  %v979_v29 = vld [vmem:[%s1519_s1 + $0x1] ss:$0 sm:$0xff] (!%p166_p9)  ;;  %s1265_s14 = smov (!%p166_p9), 88  }
   0xf   : > { %1025 = vmatpush3.bf16.msra.mxu0 (!%p166_p9), %v1159_v14  ;;  %1028 = vmatprep.mubr.msk.bf16.mxu0 (!%p166_p9), %vm1264_vm1, %v1263_v15  ;;  %s1266_s20 = smov (!%p166_p9), 96   ;;  %s1267_s22 = smov (!%p166_p9), 120   ;;  %vm307_vm2 = vcmask (!%p166_p9), 64512   ;;  %vm357_vm3 = vcmask (!%p166_p9), 130048   ;;  %vm825_vm4 = vcmask (!%p166_p9), 195584  }
  0x10   : > { %1026 = vmatprep.subr.bf16.mxu0 (!%p166_p9), %v1263_v15  ;;  %1034 = vmatprep.mubr.msk.bf16.mxu1 (!%p166_p9), %vm1264_vm1, %v1263_v15  ;;  %s1268_s23 = smov (!%p166_p9), 112   ;;  %s1271_s29 = smov (!%p166_p9), 72  }
  0x11   : > { %s1272_s30 = smov (!%p166_p9), 64   ;;  %s1274_s6 = smov (!%p166_p9), 40  }
  0x12   : > { %s1275_s7 = smov (!%p166_p9), 56   ;;  %s1276_s10 = smov (!%p166_p9), 8  }
  0x13   : > { %1027 = vmatpush3.bf16.msra.mxu0 (!%p166_p9), %v1160_v16  ;;  %s1277_s13 = smov (!%p166_p9), 16   ;;  %s1279_s9 = smov (!%p166_p9), [#allocation2]  }
  0x14   : > { %1038 = vmatprep.subr.bf16.mxu0 (!%p166_p9), %v1263_v15  ;;  %s1203_s11 = sshll.u32 (!%p166_p9), %s1279_s9, 4  ;;  %s1204_s11 = int_to_ptr.vmem [resolvable:$false] %s1203_s11 }
  0x15   : > { %s192_s27 = scalar_select %p191_p10, %s1327_s19, 1 }
  0x16   : > { %s1205_s12 = scalar_lea.vmem %s1204_s11, 512 }
  0x17   : > { %s1000_s28 = sshll.u32 %s192_s27, 4  ;;  %s1269_s27 = smov 80  }
  0x18   : > { %s195_s5 = scalar_lea.vmem %s1518_s0, %s1000_s28  ;;  %s1270_s28 = smov 104  }
  0x19   : > { %v197_v0 = vld [vmem:[%s195_s5] sm:$0xff]  ;;  %v198_v1 = vld [vmem:[%s195_s5 + $0x8] sm:$0xff]  ;;  %s1273_s5 = smov 48  }
  0x1a   : > { %v203_v2 = vsel %vm202_vm0, %v197_v0, 0.0  ;;  %v206_v3 = vsel %vm202_vm0, %v198_v1, 0.0 }
  0x1b   : > { %204 = vadd.xlane.f32.xlu0 %v203_v2 }
  0x1f   : > { %207 = vadd.xlane.f32.xlu0 %v206_v3 }
  0xa8   : > { %v205_v4 = vpop.xlane.xlu0 %204 }
  0xa9   : > { %v210_v5 = vmul.f32 0.03125, %v205_v4 }
  0xab   : > { %v212_v6 = vsub.f32 %v197_v0, %v210_v5 }
  0xac   : > { %v208_v7 = vpop.xlane.xlu0 %207 }
  0xad   : > { %v211_v8 = vmul.f32 0.03125, %v208_v7  ;;  %v214_v9 = vmul.f32 %v212_v6, %v212_v6 }
  0xaf   : > { %v213_v10 = vsub.f32 %v198_v1, %v211_v8  ;;  %v216_v11 = vsel %vm202_vm0, %v214_v9, 0.0 }
  0xb0   : > { %217 = vadd.xlane.f32.xlu1 %v216_v11 }
  0xb1   : > { %v215_v12 = vmul.f32 %v213_v10, %v213_v10 }
  0xb3   : > { %v219_v13 = vsel %vm202_vm0, %v215_v12, 0.0 }
  0xb4   : > { %220 = vadd.xlane.f32.xlu1 %v219_v13 }
 0x13d   : > { %v218_v17 = vpop.xlane.xlu1 %217 }
 0x13e   : > { %v222_v18 = vmul.f32 0.03125, %v218_v17 }
 0x140   : > { %v224_v19 = vadd.f32 1e-05, %v222_v18 }
 0x141   : > { %v221_v20 = vpop.xlane.xlu1 %220 }
 0x142   : > { %1163 = vrsqrt.f32 %v224_v19  ;;  %v223_v21 = vmul.f32 0.03125, %v221_v20 }
 0x144   : > { %v225_v22 = vadd.f32 1e-05, %v223_v21 }
 0x146   : > { %1165 = vrsqrt.f32 %v225_v22 }
 0x14c   : > { %v1164_v23 = vpop.eup %1163 }
 0x14d   : > { %v228_v24 = vmul.f32 %v1164_v23, %v212_v6 }
 0x14f   : > { %v234_v28 = vmul.f32 %v978_v25, %v228_v24 }
 0x150   : > { %v1166_v26 = vpop.eup %1165 }
 0x151   : > { %v229_v27 = vmul.f32 %v1166_v26, %v213_v10  ;;  %v240_v31 = vadd.f32 %v979_v29, %v234_v28 }
 0x153   : > { %v235_v30 = vmul.f32 %v978_v25, %v229_v27 }
 0x155   : > { %v241_v32 = vadd.f32 %v979_v29, %v235_v30 }
 0x157   : > { %v242_v33 = vpack.c.bf16 %v241_v32, %v240_v31 }
 0x159   : > { %1029 = vmatmul.mubr.msk.bf16.vlgmr.msra.gmra.mrb[0].mxu0 %vm202_vm0, %v242_v33 }
 0x15a   : > { %1040 = vmatprep.mubr.msk.bf16.mxu0 %vm1264_vm1, %v1263_v15 }
 0x22c   : > { %v296_v34 = vpop.f32.mrb[0].mxu0 }
 0x22d   : > { %v1030_v35 = vpop.f32.mrb[1].mxu0 }
 0x22e   : > { %v299_v36 = vpop.f32.mrb[2].mxu0 }
 0x22f   : > { %v1386_v37 = vpack.c.bf16 %v299_v36, %v296_v34  ;;  %v1031_v38 = vpop.f32.mrb[3].mxu0 }
 0x231   : > { %430 = vrot.lane.b32.xlu1 %v1386_v37, %s1265_s14  ;;  %305 = vrot.lane.b32.xlu0 %v1386_v37, %s1266_s20  ;;  %s1278_s14 = smov 24   ;;  %s188_s20 = sand.u32 1, %s1253_s16  }
 0x235   : > { %428 = vrot.lane.b32.xlu1 %v1386_v37, %s1267_s22  ;;  %551 = vrot.lane.b32.xlu0 %v1386_v37, %s1268_s23  ;;  %s975_s22 = sshll.u32 %s188_s20, 4 }
 0x239   : > { %553 = vrot.lane.b32.xlu1 %v1386_v37, %s1269_s27  ;;  %674 = vrot.lane.b32.xlu0 %v1386_v37, %s1270_s28  ;;  %s190_s28 = scalar_lea.vmem [#allocation2], %s975_s22 }
 0x23d   : > { %676 = vrot.lane.b32.xlu1 %v1386_v37, %s1271_s29  ;;  %s909_s29 = sshll.u32 %s190_s28, 4  ;;  %s1467_s29 = int_to_ptr.vmem [resolvable:$true] %s909_s29 }
 0x23e   : > { %s1199_s8 = scalar_lea.vmem %s1467_s29, 256  ;;  %p1206_p0 = scmp.lt.s32.totalorder %s1467_s29, %s1204_s11 }
 0x23f   : > { %p1200_p11 = scmp.ne.s32.totalorder %s1467_s29, %s1199_s8  ;;  %p1207_p1 = scmp.lt.s32.totalorder %s1205_s12, %s1199_s8 }
 0x241   : > { %p1201_p12 = pnand %p1200_p11, %p1344_p5  ;;  %p1208_p2 = por %p1207_p1, %p1206_p0 }
 0x243   : > { %p1202_p13 = pneg %p1201_p12 }
 0x245   : > { %p1209_p3 = pnand %p1208_p2, %p1202_p13 }
 0x2a3   : > { %v306_v39 = vpop.permute.xlu0 %305  ;;  %v431_v41 = vpop.permute.xlu1 %430 }
 0x2a4   : > { %v312_v40 = vsel %vm307_vm2, %v306_v39, 0  ;;  %v436_v43 = vsel %vm307_vm2, %v431_v41, 0 }
 0x2a5   : > { %1033 = vmatpush3.bf16.xpose.msra.mxu1 %v312_v40 }
 0x2a6   : > { %1044 = vmatprep.subr.bf16.mxu1 %v1263_v15 }
 0x2a7   : > { %v429_v42 = vpop.permute.xlu1 %428  ;;  %v552_v47 = vpop.permute.xlu0 %551 }
 0x2ab   : > { %v554_v44 = vpop.permute.xlu1 %553  ;;  %v675_v49 = vpop.permute.xlu0 %674 }
 0x2ac   : > { %1035 = vmatmul.mubr.msk.bf16.vlgmr.msra.gmra.mrb[0].mxu1 %vm307_vm2, %v1386_v37  ;;  %v559_v45 = vsel %vm307_vm2, %v554_v44, 0 }
 0x2ad   : > { %1045 = vmatpush3.bf16.xpose.msra.mxu1 %v436_v43  ;;  %1046 = vmatprep.mubr.msk.bf16.mxu1 %vm1264_vm1, %v1263_v15 }
 0x2ae   : > { %1056 = vmatprep.subr.bf16.mxu1 %v1263_v15 }
 0x2af   : > { %v677_v46 = vpop.permute.xlu1 %676 }
 0x2b0   : > { %v682_v48 = vsel %vm307_vm2, %v677_v46, 0 }
 0x2b4   : > { %1047 = vmatmul.mubr.msk.bf16.vlgmr.msra.gmra.mrb[4].mxu1 %vm307_vm2, %v429_v42 }
 0x2b5   : > { %1057 = vmatpush3.bf16.xpose.msra.mxu1 %v559_v45  ;;  %1058 = vmatprep.mubr.msk.bf16.mxu1 %vm1264_vm1, %v1263_v15 }
 0x2b6   : > { %1068 = vmatprep.subr.bf16.mxu1 %v1263_v15 }
 0x2bc   : > { %1059 = vmatmul.mubr.msk.bf16.vlgmr.msra.gmra.mrb[8].mxu1 %vm307_vm2, %v552_v47 }
 0x2bd   : > { %1069 = vmatpush3.bf16.xpose.msra.mxu1 %v682_v48  ;;  %1070 = vmatprep.mubr.msk.bf16.mxu1 %vm1264_vm1, %v1263_v15 }
 0x2be   : > { %1080 = vmatprep.subr.bf16.mxu1 %v1263_v15 }
 0x2c4   : > { %1071 = vmatmul.mubr.msk.bf16.vlgmr.msra.gmra.mrb[12].mxu1 %vm307_vm2, %v675_v49 }
 0x2c5   : > { %1084 = vmatprep.mubr.msk.bf16.mxu1 %vm1264_vm1, %v1263_v15 }
 0x37f   : > { %v348_v50 = vpop.f32.mrb[0].mxu1 }
 0x380   : > { %v355_v51 = vmul.f32 0.35355338, %v348_v50  ;;  %v1036_v52 = vpop.f32.mrb[1].mxu1 }
 0x381   : > { %v351_v53 = vpop.f32.mrb[2].mxu1 }
 0x382   : > { %v356_v54 = vmul.f32 0.35355338, %v351_v53  ;;  %v1037_v55 = vpop.f32.mrb[3].mxu1  ;;  %v358_v56 = vsel %vm357_vm3, %v355_v51, -inf }
 0x383   : > { %359 = vmax.xlane.f32.xlu1 %v358_v56 }
 0x384   : > { %v361_v57 = vsel %vm357_vm3, %v356_v54, -inf }
 0x385   : > { %362 = vmax.xlane.f32.xlu0 %v361_v57 }
 0x387   : > { %v472_v58 = vpop.f32.mrb[4].mxu1 }
 0x388   : > { %v479_v59 = vmul.f32 0.35355338, %v472_v58  ;;  %v1048_v60 = vpop.f32.mrb[5].mxu1 }
 0x389   : > { %v475_v61 = vpop.f32.mrb[6].mxu1 }
 0x38a   : > { %v480_v62 = vmul.f32 0.35355338, %v475_v61  ;;  %v1049_v63 = vpop.f32.mrb[7].mxu1  ;;  %v481_v0 = vsel %vm357_vm3, %v479_v59, -inf }
 0x38b   : > { %482 = vmax.xlane.f32.xlu0 %v481_v0 }
 0x38c   : > { %v484_v1 = vsel %vm357_vm3, %v480_v62, -inf }
 0x38f   : > { %485 = vmax.xlane.f32.xlu0 %v484_v1  ;;  %v595_v2 = vpop.f32.mrb[8].mxu1 }
 0x390   : > { %v602_v3 = vmul.f32 0.35355338, %v595_v2  ;;  %v1060_v4 = vpop.f32.mrb[9].mxu1 }
 0x391   : > { %v598_v5 = vpop.f32.mrb[10].mxu1 }
 0x392   : > { %v603_v6 = vmul.f32 0.35355338, %v598_v5  ;;  %v1061_v7 = vpop.f32.mrb[11].mxu1  ;;  %v604_v8 = vsel %vm357_vm3, %v602_v3, -inf }
 0x393   : > { %605 = vmax.xlane.f32.xlu1 %v604_v8 }
 0x394   : > { %v607_v9 = vsel %vm357_vm3, %v603_v6, -inf }
 0x395   : > { %608 = vmax.xlane.f32.xlu0 %v607_v9 }
 0x397   : > { %v718_v10 = vpop.f32.mrb[12].mxu1 }
 0x398   : > { %v725_v11 = vmul.f32 0.35355338, %v718_v10  ;;  %v1072_v12 = vpop.f32.mrb[13].mxu1 }
 0x399   : > { %v721_v13 = vpop.f32.mrb[14].mxu1 }
 0x39a   : > { %v726_v14 = vmul.f32 0.35355338, %v721_v13  ;;  %v1073_v16 = vpop.f32.mrb[15].mxu1  ;;  %v727_v17 = vsel %vm357_vm3, %v725_v11, -inf }
 0x39b   : > { %728 = vmax.xlane.f32.xlu1 %v727_v17 }
 0x39c   : > { %v730_v18 = vsel %vm357_vm3, %v726_v14, -inf }
 0x39d   : > { %731 = vmax.xlane.f32.xlu0 %v730_v18 }
 0x3ac   : > { %381 = vrot.lane.b32.xlu1 %v1386_v37, %s1272_s30  ;;  %s1001_s30 = sshll.u32 %s1327_s19, 8  ;;  %s1476_s19 = scalar_lea.sflag [#allocation3], %s188_s20 }
 0x410   : > { %v360_v19 = vpop.xlane.xlu1 %359 }
 0x411   : > { %v364_v20 = vsub.f32 %v355_v51, %v360_v19 }
 0x412   : > { %v363_v21 = vpop.xlane.xlu0 %362 }
 0x413   : > { %v366_v22 = vmul.f32 1.442695, %v364_v20  ;;  %v365_v23 = vsub.f32 %v356_v54, %v363_v21 }
 0x415   : > { %1167 = vpow2.f32 %v366_v22  ;;  %v368_v24 = vmul.f32 1.442695, %v365_v23 }
 0x417   : > { %1169 = vpow2.f32 %v368_v24 }
 0x418   : > { %v483_v25 = vpop.xlane.xlu0 %482 }
 0x419   : > { %v487_v26 = vsub.f32 %v479_v59, %v483_v25 }
 0x41b   : > { %v489_v27 = vmul.f32 1.442695, %v487_v26 }
 0x41c   : > { %v486_v28 = vpop.xlane.xlu0 %485 }
 0x41d   : > { %1171 = vpow2.f32 %v489_v27  ;;  %v488_v29 = vsub.f32 %v480_v62, %v486_v28 }
 0x41f   : > { %v1168_v30 = vpop.eup %1167  ;;  %v491_v31 = vmul.f32 1.442695, %v488_v29 }
 0x420   : > { %v606_v32 = vpop.xlane.xlu1 %605  ;;  %v370_v33 = vsel %vm357_vm3, %v1168_v30, 0.0 }
 0x421   : > { %v1170_v34 = vpop.eup %1169  ;;  %1173 = vpow2.f32 %v491_v31  ;;  %v610_v35 = vsub.f32 %v602_v3, %v606_v32  ;;  %371 = vadd.xlane.f32.xlu1 %v370_v33 }
 0x422   : > { %v609_v36 = vpop.xlane.xlu0 %608  ;;  %v373_v38 = vsel %vm357_vm3, %v1170_v34, 0.0 }
 0x423   : > { %v612_v39 = vmul.f32 1.442695, %v610_v35  ;;  %v611_v40 = vsub.f32 %v603_v6, %v609_v36  ;;  %374 = vadd.xlane.f32.xlu0 %v373_v38  ;;  %v1161_v35 = vld [vmem:[%s1521_s3] sm:$0xff]  }
 0x424   : > { %1081 = vmatpush3.bf16.msra.mxu1 %v1161_v35 }
 0x425   : > { %1175 = vpow2.f32 %v612_v39  ;;  %v614_v41 = vmul.f32 1.442695, %v611_v40  ;;  %1082 = vmatprep.subr.bf16.mxu1 %v1263_v15 }
 0x427   : > { %v1172_v42 = vpop.eup %1171  ;;  %1177 = vpow2.f32 %v614_v41  ;;  %v1162_v41 = vld [vmem:[%s1521_s3 + $0x8] sm:$0xff]  }
 0x428   : > { %v729_v43 = vpop.xlane.xlu1 %728  ;;  %v493_v44 = vsel %vm357_vm3, %v1172_v42, 0.0  ;;  %1083 = vmatpush3.bf16.msra.mxu1 %v1162_v41 }
 0x429   : > { %v733_v45 = vsub.f32 %v725_v11, %v729_v43  ;;  %494 = vadd.xlane.f32.xlu1 %v493_v44 }
 0x42a   : > { %v732_v46 = vpop.xlane.xlu0 %731 }
 0x42b   : > { %v1174_v47 = vpop.eup %1173  ;;  %v735_v48 = vmul.f32 1.442695, %v733_v45  ;;  %v734_v49 = vsub.f32 %v726_v14, %v732_v46 }
 0x42c   : > { %v382_v50 = vpop.permute.xlu1 %381  ;;  %v496_v51 = vsel %vm357_vm3, %v1174_v47, 0.0 }
 0x42d   : > { %1179 = vpow2.f32 %v735_v48  ;;  %v737_v52 = vmul.f32 1.442695, %v734_v49  ;;  %1039 = vmatpush3.bf16.msra.mxu0 %v382_v50  ;;  %497 = vadd.xlane.f32.xlu0 %v496_v51 }
 0x42e   : > { %1050 = vmatprep.subr.bf16.mxu0 %v1263_v15 }
 0x42f   : > { %v1176_v53 = vpop.eup %1175  ;;  %1181 = vpow2.f32 %v737_v52 }
 0x430   : > { %v616_v54 = vsel %vm357_vm3, %v1176_v53, 0.0 }
 0x431   : > { %v1178_v55 = vpop.eup %1177  ;;  %617 = vadd.xlane.f32.xlu1 %v616_v54 }
 0x432   : > { %v619_v56 = vsel %vm357_vm3, %v1178_v55, 0.0 }
 0x433   : > { %620 = vadd.xlane.f32.xlu0 %v619_v56 }
 0x437   : > { %v1180_v57 = vpop.eup %1179 }
 0x438   : > { %v739_v58 = vsel %vm357_vm3, %v1180_v57, 0.0 }
 0x439   : > { %v1182_v59 = vpop.eup %1181  ;;  %740 = vadd.xlane.f32.xlu1 %v739_v58 }
 0x43a   : > { %v742_v60 = vsel %vm357_vm3, %v1182_v59, 0.0 }
 0x43b   : > { %743 = vadd.xlane.f32.xlu0 %v742_v60 }
 0x44a   : > { %627 = vrot.lane.b32.xlu1 %v1386_v37, %s1273_s5 }
 0x44e   : > { %750 = vrot.lane.b32.xlu1 %v1386_v37, %s1274_s6 }
 0x451   : > { %504 = vrot.lane.b32.xlu0 %v1386_v37, %s1275_s7  ;;  %s1473_s7 = scalar_lea.hbm %s1522_s4, %s1001_s30 }
 0x4ae   : > { %v372_v61 = vpop.xlane.xlu1 %371 }
 0x4af   : > { %1183 = vrcp.f32 %v372_v61 }
 0x4b0   : > { %v375_v62 = vpop.xlane.xlu0 %374 }
 0x4b1   : > { %1185 = vrcp.f32 %v375_v62 }
 0x4b6   : > { %v495_v4 = vpop.xlane.xlu1 %494 }
 0x4b9   : > { %v1184_v63 = vpop.eup %1183 }
 0x4ba   : > { %v498_v0 = vpop.xlane.xlu0 %497  ;;  %v378_v2 = vmul.f32 %v1184_v63, %v1168_v30 }
 0x4bb   : > { %v1186_v1 = vpop.eup %1185  ;;  %1187 = vrcp.f32 %v498_v0 }
 0x4bc   : > { %v379_v3 = vmul.f32 %v1186_v1, %v1170_v34  ;;  %1189 = vrcp.f32 %v495_v4  ;;  %v991_v1 = vld [vmem:[%s1519_s1 + $0x2] ss:$0 sm:$0xff] }
 0x4be   : > { %v380_v5 = vpack.c.bf16 %v379_v3, %v378_v2  ;;  %v618_v37 = vpop.xlane.xlu1 %617 }
 0x4c0   : > { %1041 = vmatmul.mubr.msk.bf16.vlgmr.msra.gmra.mrb[4].mxu0 %vm357_vm3, %v380_v5  ;;  %v621_v6 = vpop.xlane.xlu0 %620 }
 0x4c1   : > { %1052 = vmatprep.mubr.msk.bf16.mxu0 %vm1264_vm1, %v1263_v15  ;;  %1191 = vrcp.f32 %v621_v6 }
 0x4c2   : > { %1193 = vrcp.f32 %v618_v37 }
 0x4c5   : > { %v1188_v7 = vpop.eup %1187 }
 0x4c6   : > { %v1190_v9 = vpop.eup %1189  ;;  %v502_v10 = vmul.f32 %v1188_v7, %v1174_v47  ;;  %v741_v11 = vpop.xlane.xlu1 %740 }
 0x4c7   : > { %v501_v12 = vmul.f32 %v1190_v9, %v1172_v42 }
 0x4c8   : > { %v744_v8 = vpop.xlane.xlu0 %743 }
 0x4c9   : > { %1195 = vrcp.f32 %v744_v8  ;;  %v503_v14 = vpack.c.bf16 %v502_v10, %v501_v12 }
 0x4ca   : > { %1197 = vrcp.f32 %v741_v11  ;;  %v628_v17 = vpop.permute.xlu1 %627 }
 0x4cb   : > { %v1192_v16 = vpop.eup %1191 }
 0x4cc   : > { %v505_v13 = vpop.permute.xlu0 %504  ;;  %v1194_v18 = vpop.eup %1193  ;;  %v625_v19 = vmul.f32 %v1192_v16, %v1178_v55 }
 0x4cd   : > { %1051 = vmatpush3.bf16.msra.mxu0 %v505_v13  ;;  %v624_v20 = vmul.f32 %v1194_v18, %v1176_v53 }
 0x4ce   : > { %1062 = vmatprep.subr.bf16.mxu0 %v1263_v15  ;;  %v751_v23 = vpop.permute.xlu1 %750 }
 0x4cf   : > { %v626_v21 = vpack.c.bf16 %v625_v19, %v624_v20 }
 0x4d0   : > { %1053 = vmatmul.mubr.msk.bf16.vlgmr.msra.gmra.mrb[8].mxu0 %vm357_vm3, %v503_v14 }
 0x4d1   : > { %1063 = vmatpush3.bf16.msra.mxu0 %v628_v17  ;;  %1064 = vmatprep.mubr.msk.bf16.mxu0 %vm1264_vm1, %v1263_v15 }
 0x4d2   : > { %1074 = vmatprep.subr.bf16.mxu0 %v1263_v15 }
 0x4d3   : > { %v1196_v22 = vpop.eup %1195 }
 0x4d4   : > { %v1198_v24 = vpop.eup %1197  ;;  %v748_v25 = vmul.f32 %v1196_v22, %v1182_v59 }
 0x4d5   : > { %v747_v26 = vmul.f32 %v1198_v24, %v1180_v57 }
 0x4d7   : > { %v749_v27 = vpack.c.bf16 %v748_v25, %v747_v26 }
 0x4d8   : > { %1065 = vmatmul.mubr.msk.bf16.vlgmr.msra.gmra.mrb[12].mxu0 %vm357_vm3, %v626_v21 }
 0x4d9   : > { %1075 = vmatpush3.bf16.msra.mxu0 %v751_v23  ;;  %1076 = vmatprep.mubr.msk.bf16.mxu0 %vm1264_vm1, %v1263_v15 }
 0x4e0   : > { %1077 = vmatmul.mubr.msk.bf16.vlgmr.msra.gmra.mrb[16].mxu0 %vm357_vm3, %v749_v27 }
 0x593   : > { %v421_v28 = vpop.f32.mrb[4].mxu0 }
 0x594   : > { %v1042_v29 = vpop.f32.mrb[5].mxu0 }
 0x595   : > { %v424_v30 = vpop.f32.mrb[6].mxu0 }
 0x596   : > { %v1043_v31 = vpop.f32.mrb[7].mxu0 }
 0x5a3   : > { %v544_v32 = vpop.f32.mrb[8].mxu0 }
 0x5a4   : > { %v1054_v33 = vpop.f32.mrb[9].mxu0 }
 0x5a5   : > { %v547_v34 = vpop.f32.mrb[10].mxu0 }
 0x5a6   : > { %v1144_v36 = vpack.i.bf16 %v547_v34, %v544_v32  ;;  %v1055_v38 = vpop.f32.mrb[11].mxu0 }
 0x5a8   : > { %1145 = vrot.lane.b32.xlu1 %v1144_v36, %s1276_s10 }
 0x5ab   : > { %v667_v39 = vpop.f32.mrb[12].mxu0 }
 0x5ac   : > { %v1066_v40 = vpop.f32.mrb[13].mxu0 }
 0x5ad   : > { %v670_v42 = vpop.f32.mrb[14].mxu0 }
 0x5ae   : > { %v1149_v43 = vpack.i.bf16 %v670_v42, %v667_v39  ;;  %v1067_v44 = vpop.f32.mrb[15].mxu0 }
 0x5b0   : > { %1150 = vrot.lane.b32.xlu0 %v1149_v43, %s1277_s13 }
 0x5b3   : > { %v790_v45 = vpop.f32.mrb[16].mxu0 }
 0x5b4   : > { %v1078_v46 = vpop.f32.mrb[17].mxu0 }
 0x5b5   : > { %v793_v47 = vpop.f32.mrb[18].mxu0 }
 0x5b6   : > { %v1154_v48 = vpack.i.bf16 %v793_v47, %v790_v45  ;;  %v1079_v49 = vpop.f32.mrb[19].mxu0 }
 0x5b8   : > { %1155 = vrot.lane.b32.xlu1 %v1154_v48, %s1278_s14 }
 0x61a   : > { %v1146_v15 = vpop.permute.xlu1 %1145 }
 0x61b   : > { %v1148_v51 = vunpack.i.h.bf16 %v1146_v15  ;;  %v1147_v52 = vunpack.i.l.bf16 %v1146_v15 }
 0x61d   : > { %v822_v56 = vsel %vm307_vm2, %v424_v30, %v1148_v51  ;;  %v821_v57 = vsel %vm307_vm2, %v421_v28, %v1147_v52 }
 0x622   : > { %v1151_v50 = vpop.permute.xlu0 %1150 }
 0x623   : > { %v1153_v53 = vunpack.i.h.bf16 %v1151_v50  ;;  %v1152_v54 = vunpack.i.l.bf16 %v1151_v50 }
 0x625   : > { %v824_v60 = vsel %vm357_vm3, %v822_v56, %v1153_v53  ;;  %v823_v61 = vsel %vm357_vm3, %v821_v57, %v1152_v54 }
 0x62a   : > { %v1156_v55 = vpop.permute.xlu1 %1155 }
 0x62b   : > { %v1158_v58 = vunpack.i.h.bf16 %v1156_v55  ;;  %v1157_v59 = vunpack.i.l.bf16 %v1156_v55 }
 0x62d   : > { %v827_v62 = vsel %vm825_vm4, %v824_v60, %v1158_v58  ;;  %v826_v63 = vsel %vm825_vm4, %v823_v61, %v1157_v59 }
 0x62e   : > { %v828_v0 = vpack.c.bf16 %v827_v62, %v826_v63 }
 0x630   : > { %1085 = vmatmul.mubr.msk.bf16.vlgmr.msra.gmra.mrb[16].mxu1 %vm202_vm0, %v828_v0 }
 0x703   : > { %v886_v2 = vpop.f32.mrb[16].mxu1 }
 0x704   : > { %v887_v3 = vadd.f32 %v991_v1, %v886_v2  ;;  %v1086_v4 = vpop.f32.mrb[17].mxu1 }
 0x705   : > { %v889_v5 = vpop.f32.mrb[18].mxu1 }
 0x706   : > { %893 = vst.msk [vmem:[%s190_s28] sm:$0xff] %vm202_vm0, %v887_v3  ;;  %v890_v6 = vadd.f32 %v991_v1, %v889_v5  ;;  %v1087_v37 = vpop.f32.mrb[19].mxu1 }
 0x708   : > { %894 = vst.msk [vmem:[%s190_s28 + $0x8] sm:$0xff] %vm202_vm0, %v890_v6 }
 0x709   : > { %1212 = shalt.err (!%p1209_p3)
}
 0x70a   : > { %s1213_s13 = scalar_lea.hbm %s1473_s7, 256  ;;  %s1217_s22 = scalar_lea.hbm %s1522_s4, 512 }
 0x70b   : > { %p1214_p4 = scmp.ne.s32.totalorder %s1473_s7, %s1213_s13  ;;  %p1218_p9 = scmp.lt.u32.totalorder %s1473_s7, %s1522_s4 }
 0x70c   : > { %p1219_p10 = scmp.lt.u32.totalorder %s1217_s22, %s1213_s13  ;;  %p1221_p12 = scmp.lt.u32.totalorder %s1213_s13, %s1473_s7 }
 0x70d   : > { %p1215_p7 = pnand %p1214_p4, %p1344_p5 }
 0x70e   : > { %p1220_p11 = por %p1219_p10, %p1218_p9 }
 0x70f   : > { %p1216_p8 = pneg %p1215_p7 }
 0x710   : > { %p1222_p13 = por %p1221_p12, %p1220_p11 }
 0x712   : > { %p1223_p0 = pnand %p1222_p13, %p1216_p8 }
 0x714   : > { %1226 = shalt.err (!%p1223_p0)
}
 0x715   : > { %s1280_s28 = smov 128  }
 0x716   : > { %1088 = dma.vmem_to_hbm [thread:$0]  (%p1344_p5), %s1467_s29, 256, %s1473_s7, %s1476_s19, %s1280_s28, %s1280_s28, %s1276_s10  }
 0x717 PF: > { %p1094_p1 = scmp.ge.s32.totalorder %s1261_s18, 2  ;;  %s924_s30 = sand.u32 1, %s1249_s15  }
 0x718   : > { %s925_s5 = scalar_lea.sflag [#allocation3], %s924_s30 }
 0x719   : > { %p1091_p2 = pnand %p1094_p1, %p1348_p6 }
 0x71b   : > { %1244 = dma.done.wait (!%p1091_p2), %s925_s5, 256  }
 0x71c   : > { %1246 = vsyncadd (!%p1091_p2), %s925_s5, 4294967040  ;;  %p14_p3 = scmp.ge.s32.totalorder %s1331_s21, 4   ;;  %s1525_s15 = smov %s1253_s16 }
 0x71d   : > { %s1526_s16 = smov %s1257_s17  ;;  %s1527_s17 = smov %s1342_s24 }
 0x71e   : > { %s1528_s18 = smov %s1331_s21  ;;  %16 = sbr.rel (!%p14_p3) target bundleno = 3 (0x3), region = 71 }
 0x725   :  { %930 = vsyncpa [#allocation3], 1 }
 0x726   :  { %932 = vsyncpa [#allocation3 + $0x1], 1 }

</bundles_post_ra>
